<compile_context>
chip_gen: v7x
topology: tpu7x:2x2x1
jax: 0.10.0
libtpu: 0.0.40
codegen_flags: <defaults>
</compile_context>

<pallas_src>
import math

import jax
import jax.numpy as jnp
from jax.experimental import pallas as pl
from jax.experimental.pallas import tpu as pltpu


# ----------------------------------------------------------------------------
# Kernel 1: batched MLP  gb = fc2(LeakyReLU(fc1(t)))    (single step, all B)
# ----------------------------------------------------------------------------
def _mlp_kernel(t_ref, w1_ref, b1_ref, w2_ref, b2_ref, gb_ref):
    # fc1: (B, Din) @ (Din, 2Din) -> (B, 2Din), f32 accumulation on the MXU.
    h = jnp.dot(t_ref[...], w1_ref[...], preferred_element_type=jnp.float32)
    h = h + b1_ref[...]
    h = jnp.where(h >= 0.0, h, 0.01 * h)               # LeakyReLU(slope=0.01)
    # fc2: (B, 2Din) @ (2Din, 2C) -> (B, 2C)
    gb = jnp.dot(h.astype(w2_ref.dtype), w2_ref[...],
                 preferred_element_type=jnp.float32)
    gb_ref[...] = gb + b2_ref[...]


# ----------------------------------------------------------------------------
# Kernel 2: streaming affine apply  out = scale * x + beta   (scale = 1+gamma)
# ----------------------------------------------------------------------------
def _apply_kernel(scale_ref, beta_ref, x_ref, o_ref):
    x = x_ref[...]                                      # (Bb, C, T_hw), native dtype
    if x.dtype != jnp.float32:
        x = x.astype(jnp.float32)                       # upcast in-register only
    # scale/beta: (Bb, C, 1) f32 -> broadcast over the lane-dense H*W tile.
    o_ref[...] = (scale_ref[...] * x + beta_ref[...]).astype(o_ref.dtype)


# ----------------------------------------------------------------------------
# Tiling helpers
# ----------------------------------------------------------------------------
def _vmem_capacity_bytes():
    try:
        return int(getattr(pltpu.get_tpu_info(), "vmem_capacity_bytes", 64 << 20))
    except Exception:
        return 64 << 20


def _choose_apply_tiles(B, C, hw, itemsize, target_bytes):
    """Pick (batch_block, hw_block) so each x tile is ~target_bytes and lane-dense."""
    if hw % 128 == 0 and C * hw * itemsize > target_bytes:
        t_hw = 128
        while (t_hw * 2 <= hw and hw % (t_hw * 2) == 0
               and C * (t_hw * 2) * itemsize <= target_bytes):
            t_hw *= 2
    else:
        # hw small (or not a multiple of 128): take the full lane extent.
        # TODO(synk): for odd spatial sizes (hw % 128 != 0) a (hw, C) layout with
        # C on the lane axis would keep v5e stores fully lane-dense.
        t_hw = hw
    bb = 1
    if t_hw == hw:
        # Feature map is small per batch row -> group batch rows per step to
        # amortize the ~0.35 us fixed per-step overhead.
        while (bb * 2 <= B and B % (bb * 2) == 0
               and (bb * 2) * C * hw * itemsize <= target_bytes):
            bb *= 2
    return bb, t_hw


# ----------------------------------------------------------------------------
# Wrapper
# ----------------------------------------------------------------------------
def feature_wise_affine(x, text_embed, params, *, use_affine_level=True,
                        compute_dtype=jnp.float32):
    """x: (B, C, H, W).  text_embed: (L=1, B, Din) (as in the parent model)."""
    if not use_affine_level:
        return x

    B, C, H, W = x.shape
    hw = H * W
    w1, b1 = params["fc1"]["w"], params["fc1"]["b"]      # (2Din, Din), (2Din,)
    w2, b2 = params["fc2"]["w"], params["fc2"]["b"]      # (2C, 2Din), (2C,)
    din, two_din = w1.shape[1], w1.shape[0]
    two_c = w2.shape[0]
    assert two_c == 2 * C
    assert text_embed.shape[0] == 1, "model calls FeatureWiseAffine with L == 1"

    # ---- stage 1: tiny batched MLP (hoisted out of the streaming loop) ------
    # text_embed.permute(1, 0, 2).float() -> (B, 1, Din) -> (B, Din)
    t = jnp.transpose(text_embed, (1, 0, 2)).astype(jnp.float32).reshape(B, din)
    # One-time weight prep outside the kernel: PyTorch (out, in) -> (in, out) so
    # both matmuls contract cleanly with no in-kernel weight transpose/relayout.
    # (Optional bf16 MXU inputs via compute_dtype; cast done once, here.)
    w1t = jnp.transpose(w1).astype(compute_dtype)        # (Din, 2Din)
    w2t = jnp.transpose(w2).astype(compute_dtype)        # (2Din, 2C)
    tc = t.astype(compute_dtype)
    b1r = b1.reshape(1, two_din).astype(jnp.float32)
    b2r = b2.reshape(1, two_c).astype(jnp.float32)

    mlp_bytes = int(sum(int(a.size) * int(a.dtype.itemsize)
                        for a in (tc, w1t, b1r, w2t, b2r)) + B * two_c * 4)
    mlp_vmem = int(min(max(2 * mlp_bytes + (2 << 20), 8 << 20), 48 << 20))
    mlp_cost = pl.CostEstimate(
        flops=2 * B * din * two_din + 2 * B * two_din * two_c,
        transcendentals=0,
        bytes_accessed=mlp_bytes)

    gb = pl.pallas_call(
        _mlp_kernel,
        out_shape=jax.ShapeDtypeStruct((B, two_c), jnp.float32),
        grid=(1,),
        in_specs=[
            pl.BlockSpec((B, din), lambda i: (0, 0)),
            pl.BlockSpec((din, two_din), lambda i: (0, 0)),
            pl.BlockSpec((1, two_din), lambda i: (0, 0)),
            pl.BlockSpec((two_din, two_c), lambda i: (0, 0)),
            pl.BlockSpec((1, two_c), lambda i: (0, 0)),
        ],
        out_specs=pl.BlockSpec((B, two_c), lambda i: (0, 0)),
        compiler_params=pltpu.CompilerParams(
            dimension_semantics=("arbitrary",),
            vmem_limit_bytes=mlp_vmem),
        cost_estimate=mlp_cost,
    )(tc, w1t, b1r, w2t, b2r)

    # (1 + gamma), beta in sublane orientation (B, C, 1) f32 — tiny arrays.
    scale3 = (1.0 + gb[:, :C]).reshape(B, C, 1)
    beta3 = gb[:, C:].reshape(B, C, 1)

    # ---- stage 2: HBM-streaming affine apply, tiled over (batch, H*W) -------
    x3 = x.reshape(B, C, hw)                             # native dtype, no upcast
    itemsize = int(jnp.dtype(x.dtype).itemsize)
    vmem_cap = _vmem_capacity_bytes()
    target_tile = max(1 << 20, min(4 << 20, vmem_cap // 32))   # ~2 MiB v7x, ~4 MiB v6e
    bb, t_hw = _choose_apply_tiles(B, C, hw, itemsize, target_tile)

    step_bytes = 2 * bb * C * t_hw * itemsize + 2 * bb * C * 4
    apply_vmem = int(min(max(2 * step_bytes + (4 << 20), 8 << 20),
                         min(48 << 20, (vmem_cap * 3) // 4)))
    apply_cost = pl.CostEstimate(
        flops=2 * B * C * hw,
        transcendentals=0,
        bytes_accessed=2 * B * C * hw * itemsize + 2 * B * C * 4)

    out = pl.pallas_call(
        _apply_kernel,
        out_shape=jax.ShapeDtypeStruct((B, C, hw), x.dtype),
        grid=(B // bb, hw // t_hw),
        in_specs=[
            pl.BlockSpec((bb, C, 1), lambda bi, hj: (bi, 0, 0)),      # 1+gamma
            pl.BlockSpec((bb, C, 1), lambda bi, hj: (bi, 0, 0)),      # beta
            pl.BlockSpec((bb, C, t_hw), lambda bi, hj: (bi, 0, hj)),  # x tile
        ],
        out_specs=pl.BlockSpec((bb, C, t_hw), lambda bi, hj: (bi, 0, hj)),
        compiler_params=pltpu.CompilerParams(
            dimension_semantics=("parallel", "parallel"),
            vmem_limit_bytes=apply_vmem),
        cost_estimate=apply_cost,
    )(scale3, beta3, x3)

    return out.reshape(B, C, H, W)


# ----------------------------------------------------------------------------
# Pure-JAX reference (correctness check only)
# ----------------------------------------------------------------------------
def feature_wise_affine_ref(x, text_embed, params):
    B, C = x.shape[0], x.shape[1]
    hp = jax.lax.Precision.HIGHEST
    t = jnp.transpose(text_embed, (1, 0, 2)).astype(jnp.float32)          # (B, 1, Din)
    h = jnp.dot(t, params["fc1"]["w"].T, precision=hp) + params["fc1"]["b"]
    h = jnp.where(h >= 0.0, h, 0.01 * h)
    gb = jnp.dot(h, params["fc2"]["w"].T, precision=hp) + params["fc2"]["b"]  # (B, 1, 2C)
    gb = gb.reshape(B, 2 * C, 1, 1)
    gamma, beta = gb[:, :C], gb[:, C:]
    return (1.0 + gamma) * x.astype(jnp.float32) + beta


# ----------------------------------------------------------------------------
if __name__ == "__main__":
    B, in_channels, out_channels = 2, 32, 4
    H, W = 16, 16

    key = jax.random.PRNGKey(0)
    kx, kt, k1, k2, k3, k4 = jax.random.split(key, 6)

    # nn.Linear default init: U(-1/sqrt(fan_in), 1/sqrt(fan_in)), PyTorch (out, in) layout.
    s1 = 1.0 / math.sqrt(in_channels)
    s2 = 1.0 / math.sqrt(2 * in_channels)
    params = {
        "fc1": {"w": jax.random.uniform(k1, (2 * in_channels, in_channels), jnp.float32, -s1, s1),
                "b": jax.random.uniform(k2, (2 * in_channels,), jnp.float32, -s1, s1)},
        "fc2": {"w": jax.random.uniform(k3, (2 * out_channels, 2 * in_channels), jnp.float32, -s2, s2),
                "b": jax.random.uniform(k4, (2 * out_channels,), jnp.float32, -s2, s2)},
    }

    x = jax.random.normal(kx, (B, out_channels, H, W), jnp.float32)
    text_embed = jax.random.normal(kt, (1, B, in_channels), jnp.float32)

    fwd = jax.jit(feature_wise_affine)
    out = fwd(x, text_embed, params)
    jax.block_until_ready(out)
    assert out.shape == (B, out_channels, H, W), out.shape

    ref = feature_wise_affine_ref(x, text_embed, params)
    assert bool(jnp.allclose(out, ref.astype(out.dtype), rtol=2e-3, atol=2e-3)), \
        float(jnp.max(jnp.abs(out - ref)))

    print("KERNEL_OK")
</pallas_src>

<mosaic_0001>
module attributes {stable_mosaic.version = 11 : i64} {
  func.func @_mlp_kernel(%arg0: i32, %arg1: memref<2x32xf32, #tpu.memory_space<vmem>>, %arg2: memref<32x64xf32, #tpu.memory_space<vmem>>, %arg3: memref<1x64xf32, #tpu.memory_space<vmem>>, %arg4: memref<64x8xf32, #tpu.memory_space<vmem>>, %arg5: memref<1x8xf32, #tpu.memory_space<vmem>>, %arg6: memref<2x8xf32, #tpu.memory_space<vmem>>) attributes {dimension_semantics = [#tpu.dimension_semantics<arbitrary>], iteration_bounds = array<i64: 1>, scalar_prefetch = 0 : i64, scratch_operands = 0 : i64, tpu.core_type = #tpu.core_type<tc>, window_params = [{pipeline_mode = #tpu.pipeline_mode<synchronous>, transform_indices = @transform_0, window_bounds = array<i64: 2, 32>}, {pipeline_mode = #tpu.pipeline_mode<synchronous>, transform_indices = @transform_1, window_bounds = array<i64: 32, 64>}, {pipeline_mode = #tpu.pipeline_mode<synchronous>, transform_indices = @transform_2, window_bounds = array<i64: 1, 64>}, {pipeline_mode = #tpu.pipeline_mode<synchronous>, transform_indices = @transform_3, window_bounds = array<i64: 64, 8>}, {pipeline_mode = #tpu.pipeline_mode<synchronous>, transform_indices = @transform_4, window_bounds = array<i64: 1, 8>}, {pipeline_mode = #tpu.pipeline_mode<synchronous>, transform_indices = @transform_5, window_bounds = array<i64: 2, 8>}]} {
    %c0 = arith.constant 0 : index
    %c0_0 = arith.constant 0 : index
    %0 = vector.load %arg1[%c0, %c0_0] : memref<2x32xf32, #tpu.memory_space<vmem>>, vector<2x32xf32>
    %c0_1 = arith.constant 0 : index
    %c0_2 = arith.constant 0 : index
    %1 = vector.load %arg2[%c0_1, %c0_2] : memref<32x64xf32, #tpu.memory_space<vmem>>, vector<32x64xf32>
    %cst = arith.constant dense<0.000000e+00> : vector<2x64xf32>
    %2 = tpu.matmul %0, %1, %cst {dimension_numbers = #tpu.dot_dimension_numbers<[1], [0], [0], [1], [0, 0, 1, 1], [], []>} : vector<2x32xf32>, vector<32x64xf32>, vector<2x64xf32> -> vector<2x64xf32>
    %c0_3 = arith.constant 0 : index
    %c0_4 = arith.constant 0 : index
    %3 = vector.load %arg3[%c0_3, %c0_4] : memref<1x64xf32, #tpu.memory_space<vmem>>, vector<1x64xf32>
    %4 = vector.broadcast %3 : vector<1x64xf32> to vector<2x64xf32>
    %5 = arith.addf %2, %4 : vector<2x64xf32>
    %cst_5 = arith.constant 0.000000e+00 : f32
    %6 = vector.broadcast %cst_5 : f32 to vector<2x64xf32>
    %7 = arith.cmpf oge, %5, %6 : vector<2x64xf32>
    %cst_6 = arith.constant 0.00999999977 : f32
    %8 = vector.broadcast %cst_6 : f32 to vector<2x64xf32>
    %9 = arith.mulf %8, %5 : vector<2x64xf32>
    %10 = arith.select %7, %5, %9 : vector<2x64xi1>, vector<2x64xf32>
    %c0_7 = arith.constant 0 : index
    %c0_8 = arith.constant 0 : index
    %11 = vector.load %arg4[%c0_7, %c0_8] : memref<64x8xf32, #tpu.memory_space<vmem>>, vector<64x8xf32>
    %cst_9 = arith.constant dense<0.000000e+00> : vector<2x8xf32>
    %12 = tpu.matmul %10, %11, %cst_9 {dimension_numbers = #tpu.dot_dimension_numbers<[1], [0], [0], [1], [0, 0, 1, 1], [], []>} : vector<2x64xf32>, vector<64x8xf32>, vector<2x8xf32> -> vector<2x8xf32>
    %c0_10 = arith.constant 0 : index
    %c0_11 = arith.constant 0 : index
    %13 = vector.load %arg5[%c0_10, %c0_11] : memref<1x8xf32, #tpu.memory_space<vmem>>, vector<1x8xf32>
    %14 = vector.broadcast %13 : vector<1x8xf32> to vector<2x8xf32>
    %15 = arith.addf %12, %14 : vector<2x8xf32>
    %c0_12 = arith.constant 0 : index
    %c0_13 = arith.constant 0 : index
    %16 = vector.load %arg6[%c0_12, %c0_13] : memref<2x8xf32, #tpu.memory_space<vmem>>, vector<2x8xf32>
    tpu.vector_store %arg6[%c0_12, %c0_13], %15 {strides = array<i32>} : memref<2x8xf32, #tpu.memory_space<vmem>>, vector<2x8xf32>,
    return
  }
  func.func @transform_0(%arg0: i32) -> (i32, i32) {
    %c0_i32 = arith.constant 0 : i32
    %c0_i32_0 = arith.constant 0 : i32
    %c0_i32_1 = arith.constant 0 : i32
    return %c0_i32, %c0_i32_0 : i32, i32
  }
  func.func @transform_1(%arg0: i32) -> (i32, i32) {
    %c0_i32 = arith.constant 0 : i32
    %c0_i32_0 = arith.constant 0 : i32
    %c0_i32_1 = arith.constant 0 : i32
    return %c0_i32, %c0_i32_0 : i32, i32
  }
  func.func @transform_2(%arg0: i32) -> (i32, i32) {
    %c0_i32 = arith.constant 0 : i32
    %c0_i32_0 = arith.constant 0 : i32
    %c0_i32_1 = arith.constant 0 : i32
    return %c0_i32, %c0_i32_0 : i32, i32
  }
  func.func @transform_3(%arg0: i32) -> (i32, i32) {
    %c0_i32 = arith.constant 0 : i32
    %c0_i32_0 = arith.constant 0 : i32
    %c0_i32_1 = arith.constant 0 : i32
    return %c0_i32, %c0_i32_0 : i32, i32
  }
  func.func @transform_4(%arg0: i32) -> (i32, i32) {
    %c0_i32 = arith.constant 0 : i32
    %c0_i32_0 = arith.constant 0 : i32
    %c0_i32_1 = arith.constant 0 : i32
    return %c0_i32, %c0_i32_0 : i32, i32
  }
  func.func @transform_5(%arg0: i32) -> (i32, i32) {
    %c0_i32 = arith.constant 0 : i32
    %c0_i32_0 = arith.constant 0 : i32
    %c0_i32_1 = arith.constant 0 : i32
    return %c0_i32, %c0_i32_0 : i32, i32
  }
}

module attributes {stable_mosaic.version = 11 : i64} {
  func.func @_apply_kernel(%arg0: i32, %arg1: i32, %arg2: memref<2x4x1xf32, #tpu.memory_space<vmem>>, %arg3: memref<2x4x1xf32, #tpu.memory_space<vmem>>, %arg4: memref<2x4x256xf32, #tpu.memory_space<vmem>>, %arg5: memref<2x4x256xf32, #tpu.memory_space<vmem>>) attributes {dimension_semantics = [#tpu.dimension_semantics<parallel>, #tpu.dimension_semantics<parallel>], iteration_bounds = array<i64: 1, 1>, scalar_prefetch = 0 : i64, scratch_operands = 0 : i64, tpu.core_type = #tpu.core_type<tc>, window_params = [{transform_indices = @transform_0, window_bounds = array<i64: 2, 4, 1>}, {transform_indices = @transform_1, window_bounds = array<i64: 2, 4, 1>}, {transform_indices = @transform_2, window_bounds = array<i64: 2, 4, 256>}, {transform_indices = @transform_3, window_bounds = array<i64: 2, 4, 256>}]} {
    %c0 = arith.constant 0 : index
    %c0_0 = arith.constant 0 : index
    %c0_1 = arith.constant 0 : index
    %0 = vector.load %arg4[%c0, %c0_0, %c0_1] : memref<2x4x256xf32, #tpu.memory_space<vmem>>, vector<2x4x256xf32>
    %c0_2 = arith.constant 0 : index
    %c0_3 = arith.constant 0 : index
    %c0_4 = arith.constant 0 : index
    %1 = vector.load %arg2[%c0_2, %c0_3, %c0_4] : memref<2x4x1xf32, #tpu.memory_space<vmem>>, vector<2x4x1xf32>
    %2 = vector.broadcast %1 : vector<2x4x1xf32> to vector<2x4x256xf32>
    %3 = arith.mulf %2, %0 : vector<2x4x256xf32>
    %c0_5 = arith.constant 0 : index
    %c0_6 = arith.constant 0 : index
    %c0_7 = arith.constant 0 : index
    %4 = vector.load %arg3[%c0_5, %c0_6, %c0_7] : memref<2x4x1xf32, #tpu.memory_space<vmem>>, vector<2x4x1xf32>
    %5 = vector.broadcast %4 : vector<2x4x1xf32> to vector<2x4x256xf32>
    %6 = arith.addf %3, %5 : vector<2x4x256xf32>
    %c0_8 = arith.constant 0 : index
    %c0_9 = arith.constant 0 : index
    %c0_10 = arith.constant 0 : index
    %7 = vector.load %arg5[%c0_8, %c0_9, %c0_10] : memref<2x4x256xf32, #tpu.memory_space<vmem>>, vector<2x4x256xf32>
    tpu.vector_store %arg5[%c0_8, %c0_9, %c0_10], %6 {strides = array<i32>} : memref<2x4x256xf32, #tpu.memory_space<vmem>>, vector<2x4x256xf32>,
    return
  }
  func.func @transform_0(%arg0: i32, %arg1: i32) -> (i32, i32, i32) {
    %c0_i32 = arith.constant 0 : i32
    %c0_i32_0 = arith.constant 0 : i32
    %c0_i32_1 = arith.constant 0 : i32
    return %arg0, %c0_i32, %c0_i32_0 : i32, i32, i32
  }
  func.func @transform_1(%arg0: i32, %arg1: i32) -> (i32, i32, i32) {
    %c0_i32 = arith.constant 0 : i32
    %c0_i32_0 = arith.constant 0 : i32
    %c0_i32_1 = arith.constant 0 : i32
    return %arg0, %c0_i32, %c0_i32_0 : i32, i32, i32
  }
  func.func @transform_2(%arg0: i32, %arg1: i32) -> (i32, i32, i32) {
    %c0_i32 = arith.constant 0 : i32
    %c0_i32_0 = arith.constant 0 : i32
    return %arg0, %c0_i32, %arg1 : i32, i32, i32
  }
  func.func @transform_3(%arg0: i32, %arg1: i32) -> (i32, i32, i32) {
    %c0_i32 = arith.constant 0 : i32
    %c0_i32_0 = arith.constant 0 : i32
    return %arg0, %c0_i32, %arg1 : i32, i32, i32
  }
}

</mosaic_0001>

<bundles_post_ra>
// kernel: feature_wise_affine.2
= control target key start
LH: loop header
LB: loop body
LE: loop exit
PB: predicated region body
PF: predicated region fallthrough
CT: control target
= control target key end

     0   :  { %v273_v0 = vmov 0.0|0.0   ;;  %vm274_vm0 = vmmov 0   ;;  %v275_v4 = vmov 0.0   ;;  %vm32_vm1 = vcmask 261120   ;;  %s354_s1 = inlined_call_operand.vmem [shape: f32[32,64], index: 1, kind: input, shape index: {}]   ;;  %s355_s3 = inlined_call_operand.vmem [shape: f32[64,8], index: 3, kind: input, shape index: {}]   ;;  %s356_s0 = inlined_call_operand.vmem [shape: f32[2,32], index: 0, kind: input, shape index: {}]   ;;  %s357_s2 = inlined_call_operand.vmem [shape: f32[1,64], index: 2, kind: input, shape index: {}]   ;;  %s358_s4 = inlined_call_operand.vmem [shape: f32[1,8], index: 4, kind: input, shape index: {}]   ;;  %s359_s5 = inlined_call_operand.vmem [shape: f32[2,8], index: 5, kind: output, shape index: {}]  }
   0x1   :  { %252 = vmatprep.subr.bf16.mxu0 %v273_v0  ;;  %v21_v1 = vld [vmem:[%s354_s1] sm:$0xff]  ;;  %v22_v2 = vld [vmem:[%s354_s1 + $0x8] sm:$0xff]  ;;  %v23_v3 = vld [vmem:[%s354_s1 + $0x10] sm:$0xff]  ;;  %230 = vmatprep.mubr.msk.f32.mxu0 %vm274_vm0, %v275_v4  ;;  %vm124_vm3 = vcmask 523264   ;;  %vm198_vm4 = vcmask 58368  }
   0x2   :  { %v253_v5 = vpack.c.bf16 %v22_v2, %v21_v1  ;;  %v24_v6 = vld [vmem:[%s354_s1 + $0x18] sm:$0xff]  ;;  %258 = vmatprep.subr.bf16.mxu1 %v273_v0  ;;  %v109_v7 = vld [vmem:[%s355_s3] sm:$0xff]  ;;  %249 = vmatprep.mubr.msk.f32.mxu1 %vm274_vm0, %v275_v4  ;;  %v110_v8 = vld [vmem:[%s355_s3 + $0x8] sm:$0xff] }
   0x3   :  { %v111_v9 = vld [vmem:[%s355_s3 + $0x10] sm:$0xff]  ;;  %v112_v10 = vld [vmem:[%s355_s3 + $0x18] sm:$0xff]  ;;  %v256_v11 = vpack.c.bf16 %v24_v6, %v23_v3  ;;  %v259_v12 = vpack.c.bf16 %v110_v8, %v109_v7  ;;  %v113_v14 = vld [vmem:[%s355_s3 + $0x20] sm:$0xff] }
   0x4   :  { %254 = vmatpush3.bf16.msra.mxu0 %v253_v5  ;;  %v262_v13 = vpack.c.bf16 %v112_v10, %v111_v9  ;;  %v114_v15 = vld [vmem:[%s355_s3 + $0x28] sm:$0xff]  ;;  %v20_v16 = vld [vmem:[%s356_s0] sm:$0x3]  ;;  %v115_v18 = vld [vmem:[%s355_s3 + $0x30] sm:$0xff] }
   0x5   :  { %255 = vmatprep.subr.bf16.mxu0 %v273_v0  ;;  %260 = vmatpush3.bf16.msra.mxu1 %v259_v12  ;;  %v265_v17 = vpack.c.bf16 %v114_v15, %v113_v14  ;;  %v116_v19 = vld [vmem:[%s355_s3 + $0x38] sm:$0xff]  ;;  %v204_v21 = vld [vmem:[%s357_s2] ss:$0 sm:$0xff] }
   0x6   :  { %261 = vmatprep.subr.bf16.mxu1 %v273_v0  ;;  %v268_v20 = vpack.c.bf16 %v116_v19, %v115_v18  ;;  %v206_v27 = vld [vmem:[%s358_s4] ss:$0 sm:$0xff] }
   0x8   :  { %257 = vmatpush3.bf16.msra.mxu0 %v256_v11 }
   0x9   :  { %263 = vmatpush3.bf16.msra.mxu1 %v262_v13 }
   0xa   :  { %264 = vmatprep.subr.bf16.mxu1 %v273_v0 }
   0xb   :  { %231 = vmatmul.mubr.msk.f32.vlgmr.msra.gmra.mrb[0].mxu0 %vm32_vm1, %v20_v16 }
   0xd   :  { %266 = vmatpush3.bf16.msra.mxu1 %v265_v17 }
   0xe   :  { %267 = vmatprep.subr.bf16.mxu1 %v273_v0 }
  0x11   :  { %269 = vmatpush3.bf16.msra.mxu1 %v268_v20 }
  0xde   :  { %v102_v22 = vpop.f32.mrb[0].mxu0 }
  0xdf   :  { %v103_v23 = vadd.f32 %v204_v21, %v102_v22  ;;  %v232_v24 = vpop.f32.mrb[1].mxu0 }
  0xe1   :  { %vm106_vm2 = vcmp.ge.f32.partialorder %v103_v23, 0.0  ;;  %v107_v25 = vmul.f32 0.01, %v103_v23 }
  0xe3   :  { %v108_v26 = vsel %vm106_vm2, %v103_v23, %v107_v25 }
  0xe4   :  { %250 = vmatmul.mubr.msk.f32.vlgmr.msra.gmra.mrb[0].mxu1 %vm124_vm3, %v108_v26 }
 0x1b7   :  { %v194_v28 = vpop.f32.mrb[0].mxu1 }
 0x1b8   :  { %v195_v29 = vadd.f32 %v206_v27, %v194_v28  ;;  %v251_v30 = vpop.f32.mrb[1].mxu1 }
 0x1ba   :  { %199 = vst.msk [vmem:[%s359_s5] sm:$0x3] %vm198_vm4, %v195_v29 }

// kernel: feature_wise_affine.3
= control target key start
LH: loop header
LB: loop body
LE: loop exit
PB: predicated region body
PF: predicated region fallthrough
CT: control target
= control target key end

     0   :  { %v73_v0 = vmov 0   ;;  %s118_s1 = inlined_call_operand.vmem [shape: f32[2,4,1], index: 1, kind: input, shape index: {}]   ;;  %s119_s0 = inlined_call_operand.vmem [shape: f32[2,4,1], index: 0, kind: input, shape index: {}]   ;;  %s120_s2 = inlined_call_operand.vmem [shape: f32[2,4,256], index: 2, kind: input, shape index: {}]   ;;  %s121_s3 = inlined_call_operand.vmem [shape: f32[2,4,256], index: 3, kind: output, shape index: {}]  }
   0x1   :  { %70 = vset.pattern.permute.xlu1 %v73_v0  ;;  %69 = vset.pattern.permute.xlu0 %v73_v0  ;;  %v38_v1 = vld [vmem:[%s118_s1] sm:$0xf]  ;;  %v39_v3 = vld [vmem:[%s118_s1 + $0x4] sm:$0xf]  ;;  %v15_v7 = vld [vmem:[%s120_s2 + $0x8] sm:$0xff] }
   0x2   :  { %v16_v2 = vld [vmem:[%s119_s0] sm:$0xf]  ;;  %42 = vperm.xlu1 %70, %v38_v1   ;;  %v17_v4 = vld [vmem:[%s119_s0 + $0x4] sm:$0xf]  ;;  %v31_v12 = vcombine.high %v15_v7, %v15_v7 }
   0x3   :  { %20 = vperm.xlu0 %69, %v16_v2   ;;  %v14_v5 = vld [vmem:[%s120_s2] sm:$0xff] }
   0x4   :  { %v30_v6 = vcombine.high %v14_v5, %v14_v5 }
   0x6   :  { %47 = vperm.xlu1 %70, %v39_v3  }
   0x7   :  { %25 = vperm.xlu0 %69, %v17_v4  }
  0x81   :  { %v43_v8 = vpop.permute.xlu1 %42 }
  0x82   :  { %v21_v9 = vpop.permute.xlu0 %20 }
  0x83   :  { %v34_v10 = vmul.f32 %v21_v9, %v14_v5  ;;  %v35_v11 = vmul.f32 %v30_v6, %v21_v9 }
  0x85   :  { %v50_v13 = vadd.f32 %v43_v8, %v34_v10  ;;  %v51_v14 = vadd.f32 %v43_v8, %v35_v11  ;;  %v48_v19 = vpop.permute.xlu1 %47 }
  0x86   :  { %v26_v15 = vpop.permute.xlu0 %25 }
  0x87   :  { %v58_v16 = vcombine.low %v50_v13, %v51_v14  ;;  %v36_v17 = vmul.f32 %v26_v15, %v15_v7  ;;  %v37_v18 = vmul.f32 %v31_v12, %v26_v15 }
  0x89   :  { %62 = vst [vmem:[%s121_s3] sm:$0xff] %v58_v16  ;;  %v52_v20 = vadd.f32 %v48_v19, %v36_v17  ;;  %v53_v21 = vadd.f32 %v48_v19, %v37_v18 }
  0x8b   :  { %v59_v22 = vcombine.low %v52_v20, %v53_v21 }
  0x8d   :  { %63 = vst [vmem:[%s121_s3 + $0x8] sm:$0xff] %v59_v22 }

</bundles_post_ra>
